<compile_context>
chip_gen: v7x
topology: tpu7x:2x2x1
jax: 0.10.0
libtpu: 0.0.40
codegen_flags: <defaults>
</compile_context>

<pallas_src>
import jax
import jax.numpy as jnp
from jax.experimental import pallas as pl
from jax.experimental.pallas import tpu as pltpu

EPS = 1e-08


def _wasl_kernel(x_ref, y_ref, psum_ref):
    """One row tile: elementwise loss + per-class (column) partial sum."""
    x = x_ref[...].astype(jnp.float32)
    y = y_ref[...].astype(jnp.float32)

    los_pos = y * jnp.log(jnp.maximum(x, EPS))
    los_neg = (1.0 - y) * jnp.log(jnp.maximum(1.0 - x, EPS))
    loss = los_pos + x * los_neg  # neg_weight = 1 - (1 - x) == x

    # Per-class partial sum for this tile: (1, C), lane-dense store.
    psum_ref[0] = jnp.sum(loss, axis=0, keepdims=True)


def _choose_block_rows(n, c):
    """Row tile sized to ~2 MiB per input block (f32).

    Big enough to amortize the ~0.35 us per-grid-step overhead; small enough
    that 2 inputs x 2 pipeline buffers (~8 MiB) stay under every generation's
    scoped-VMEM budget, including v7x (64 MiB physical / 32 MiB default).
    """
    target_bytes = 2 << 20
    rows = max(8, min(2048, target_bytes // (c * 4)))
    rows = (rows // 8) * 8
    n_pad8 = ((n + 7) // 8) * 8
    return max(8, min(rows, n_pad8))


def weighted_asymmetric_loss(x, y, weight=None, *, block_rows=None):
    """Pallas TPU forward of WeightedAsymmetricLoss. Returns a scalar."""
    assert x.shape == y.shape and x.ndim == 2
    n, c = x.shape

    br = _choose_block_rows(n, c) if block_rows is None else block_rows
    num_tiles = pl.cdiv(n, br)
    n_pad = num_tiles * br
    if n_pad != n:
        # Zero-padded rows contribute exactly 0: y=0, x=0 -> los_pos = 0,
        # x * los_neg = 0. The final divide uses the true n * c.
        pad = n_pad - n
        x = jnp.pad(x, ((0, pad), (0, 0)))
        y = jnp.pad(y, ((0, pad), (0, 0)))

    bytes_per_elem = x.dtype.itemsize + y.dtype.itemsize
    cost = pl.CostEstimate(
        flops=6 * n_pad * c,
        transcendentals=2 * n_pad * c,
        bytes_accessed=n_pad * c * bytes_per_elem + num_tiles * c * 4,
    )

    partial = pl.pallas_call(
        _wasl_kernel,
        out_shape=jax.ShapeDtypeStruct((num_tiles, 1, c), jnp.float32),
        grid=(num_tiles,),
        in_specs=[
            pl.BlockSpec((br, c), lambda i: (i, 0)),  # x tile
            pl.BlockSpec((br, c), lambda i: (i, 0)),  # y tile
        ],
        out_specs=pl.BlockSpec((1, 1, c), lambda i: (i, 0, 0)),
        compiler_params=pltpu.CompilerParams(
            dimension_semantics=("parallel",),  # no carried state -> megacore OK
            vmem_limit_bytes=32 << 20,
        ),
        cost_estimate=cost,
    )(x, y)

    # Tiny finalize: per-class totals, deferred weight, global mean, negate.
    col_sums = jnp.sum(partial, axis=(0, 1))  # (C,)
    if weight is not None:
        w = jnp.asarray(weight, jnp.float32).reshape(-1)
        total = jnp.sum(col_sums * w)
    else:
        total = jnp.sum(col_sums)
    return -total / jnp.float32(n * c)


def _reference(x, y, weight=None):
    xs_neg = 1.0 - x
    los_pos = y * jnp.log(jnp.maximum(x, EPS))
    los_neg = (1.0 - y) * jnp.log(jnp.maximum(xs_neg, EPS))
    loss = los_pos + (1.0 - xs_neg) * los_neg
    if weight is not None:
        loss = loss * weight.reshape(1, -1)
    return -loss.mean(axis=-1).mean()


if __name__ == "__main__":
    key = jax.random.PRNGKey(0)
    k1, k2, k3, k4 = jax.random.split(key, 4)

    # Case 1: (batch=16, num_classes=128) with a per-class weight.
    N, C = 16, 128
    x = jax.random.uniform(k1, (N, C), jnp.float32, minval=0.0, maxval=1.0)
    y = (jax.random.uniform(k2, (N, C), jnp.float32) > 0.5).astype(jnp.float32)
    weight = 0.5 + jnp.arange(C, dtype=jnp.float32) / C

    out = jax.block_until_ready(weighted_asymmetric_loss(x, y, weight))
    ref = _reference(x, y, weight)
    assert jnp.allclose(out, ref, rtol=1e-5, atol=1e-6), (out, ref)

    # Case 2: non-divisible batch (exercises zero padding), no weight.
    N2, C2 = 13, 128
    x2 = jax.random.uniform(k3, (N2, C2), jnp.float32, minval=0.0, maxval=1.0)
    y2 = (jax.random.uniform(k4, (N2, C2), jnp.float32) > 0.5).astype(jnp.float32)
    out2 = jax.block_until_ready(weighted_asymmetric_loss(x2, y2))
    ref2 = _reference(x2, y2)
    assert jnp.allclose(out2, ref2, rtol=1e-5, atol=1e-6), (out2, ref2)

    print("KERNEL_OK")
</pallas_src>

<mosaic_0001>
module attributes {stable_mosaic.version = 11 : i64} {
  func.func @_wasl_kernel(%arg0: i32, %arg1: memref<16x128xf32, #tpu.memory_space<vmem>>, %arg2: memref<16x128xf32, #tpu.memory_space<vmem>>, %arg3: memref<1x1x128xf32, #tpu.memory_space<vmem>>) attributes {dimension_semantics = [#tpu.dimension_semantics<parallel>], iteration_bounds = array<i64: 1>, scalar_prefetch = 0 : i64, scratch_operands = 0 : i64, tpu.core_type = #tpu.core_type<tc>, window_params = [{transform_indices = @transform_0, window_bounds = array<i64: 16, 128>}, {transform_indices = @transform_1, window_bounds = array<i64: 16, 128>}, {transform_indices = @transform_2, window_bounds = array<i64: 1, 1, 128>}]} {
    %c0 = arith.constant 0 : index
    %c0_0 = arith.constant 0 : index
    %0 = vector.load %arg1[%c0, %c0_0] : memref<16x128xf32, #tpu.memory_space<vmem>>, vector<16x128xf32>
    %c0_1 = arith.constant 0 : index
    %c0_2 = arith.constant 0 : index
    %1 = vector.load %arg2[%c0_1, %c0_2] : memref<16x128xf32, #tpu.memory_space<vmem>>, vector<16x128xf32>
    %cst = arith.constant 9.99999993E-9 : f32
    %2 = vector.broadcast %cst : f32 to vector<16x128xf32>
    %3 = arith.maximumf %0, %2 : vector<16x128xf32>
    %4 = math.log %3 : vector<16x128xf32>
    %5 = arith.mulf %1, %4 : vector<16x128xf32>
    %cst_3 = arith.constant 1.000000e+00 : f32
    %6 = vector.broadcast %cst_3 : f32 to vector<16x128xf32>
    %7 = arith.subf %6, %1 : vector<16x128xf32>
    %cst_4 = arith.constant 1.000000e+00 : f32
    %8 = vector.broadcast %cst_4 : f32 to vector<16x128xf32>
    %9 = arith.subf %8, %0 : vector<16x128xf32>
    %cst_5 = arith.constant 9.99999993E-9 : f32
    %10 = vector.broadcast %cst_5 : f32 to vector<16x128xf32>
    %11 = arith.maximumf %9, %10 : vector<16x128xf32>
    %12 = math.log %11 : vector<16x128xf32>
    %13 = arith.mulf %7, %12 : vector<16x128xf32>
    %14 = arith.mulf %0, %13 : vector<16x128xf32>
    %15 = arith.addf %5, %14 : vector<16x128xf32>
    %cst_6 = arith.constant dense<0.000000e+00> : vector<128xf32>
    %16 = vector.multi_reduction <add>, %15, %cst_6 [0] : vector<16x128xf32> to vector<128xf32>
    %17 = vector.shape_cast %16 : vector<128xf32> to vector<1x128xf32>
    %c0_7 = arith.constant 0 : index
    %c0_8 = arith.constant 0 : index
    %c0_9 = arith.constant 0 : index
    %18 = vector.load %arg3[%c0_7, %c0_8, %c0_9] : memref<1x1x128xf32, #tpu.memory_space<vmem>>, vector<1x1x128xf32>
    %19 = vector.shape_cast %18 : vector<1x1x128xf32> to vector<1x128xf32>
    %20 = vector.shape_cast %17 : vector<1x128xf32> to vector<1x1x128xf32>
    tpu.vector_store %arg3[%c0_7, %c0_8, %c0_9], %20 {strides = array<i32>} : memref<1x1x128xf32, #tpu.memory_space<vmem>>, vector<1x1x128xf32>,
    return
  }
  func.func @transform_0(%arg0: i32) -> (i32, i32) {
    %c0_i32 = arith.constant 0 : i32
    %c0_i32_0 = arith.constant 0 : i32
    return %arg0, %c0_i32 : i32, i32
  }
  func.func @transform_1(%arg0: i32) -> (i32, i32) {
    %c0_i32 = arith.constant 0 : i32
    %c0_i32_0 = arith.constant 0 : i32
    return %arg0, %c0_i32 : i32, i32
  }
  func.func @transform_2(%arg0: i32) -> (i32, i32, i32) {
    %c0_i32 = arith.constant 0 : i32
    %c0_i32_0 = arith.constant 0 : i32
    %c0_i32_1 = arith.constant 0 : i32
    return %arg0, %c0_i32, %c0_i32_0 : i32, i32, i32
  }
}

</mosaic_0001>

<bundles_post_ra>
// kernel: tpu_custom_call.1
= control target key start
LH: loop header
LB: loop body
LE: loop exit
PB: predicated region body
PF: predicated region fallthrough
CT: control target
= control target key end

     0   :  { %7 = vsyncpa [#allocation3], 0  ;;  %s233_s0 = inlined_call_operand.hbm [shape: f32[16,128], index: 0, kind: input, shape index: {}]   ;;  %s234_s1 = inlined_call_operand.hbm [shape: f32[16,128], index: 1, kind: input, shape index: {}]   ;;  %s235_s2 = inlined_call_operand.hbm [shape: f32[1,1,128], index: 2, kind: output, shape index: {}]  }
   0x1   :  { %8 = vsyncpa [#allocation6], 0 }
   0x2   :  { %9 = vsyncpa [#allocation4], 0  ;;  %s177_s9 = smov [#allocation2]   ;;  %s105_s13 = scalar_lea.hbm %s233_s0, 256 }
   0x3   :  { %s15_s10 = sshll.u32 %s177_s9, 4  ;;  %p106_p0 = scmp.ne.s32.totalorder %s233_s0, %s105_s13  ;;  %s16_s10 = int_to_ptr.vmem [resolvable:$true] %s15_s10 }
   0x4   :  { %p109_p1 = scmp.lt.u32.totalorder %s105_s13, %s233_s0 }
   0x6   :  { %p111_p2 = pnand %p109_p1, %p106_p0 }
   0x8   :  { %114 = shalt.err (!%p111_p2)
}
   0x9   :  { %s115_s18 = scalar_lea.vmem %s16_s10, 256  ;;  %p120_p4 = scmp.lt.s32.totalorder %s16_s10, %s16_s10 }
   0xa   :  { %p116_p3 = scmp.ne.s32.totalorder %s16_s10, %s115_s18  ;;  %p121_p5 = scmp.lt.s32.totalorder %s115_s18, %s115_s18 }
   0xc   :  { %p122_p6 = por %p121_p5, %p120_p4 }
   0xe   :  { %p123_p7 = pnand %p122_p6, %p116_p3 }
  0x10   :  { %126 = shalt.err (!%p123_p7)
}
  0x11   :  { %s178_s19 = smov 128   ;;  %s179_s20 = smov 8  }
  0x12   :  { %21 = dma.hbm_to_vmem [thread:$0]  %s233_s0, 256, %s16_s10, [#allocation3], %s178_s19, %s178_s19, %s179_s20  }
  0x13   :  { %s180_s23 = smov [#allocation5]   ;;  %s127_s27 = scalar_lea.hbm %s234_s1, 256 }
  0x14   :  { %s27_s24 = sshll.u32 %s180_s23, 4  ;;  %p128_p8 = scmp.ne.s32.totalorder %s234_s1, %s127_s27  ;;  %s28_s24 = int_to_ptr.vmem [resolvable:$true] %s27_s24 }
  0x15   :  { %p131_p9 = scmp.lt.u32.totalorder %s127_s27, %s234_s1 }
  0x17   :  { %p133_p10 = pnand %p131_p9, %p128_p8 }
  0x19   :  { %136 = shalt.err (!%p133_p10)
}
  0x1a   :  { %s137_s4 = scalar_lea.vmem %s28_s24, 256  ;;  %p142_p12 = scmp.lt.s32.totalorder %s28_s24, %s28_s24 }
  0x1b   :  { %p138_p11 = scmp.ne.s32.totalorder %s28_s24, %s137_s4  ;;  %p143_p13 = scmp.lt.s32.totalorder %s137_s4, %s137_s4 }
  0x1d   :  { %p144_p0 = por %p143_p13, %p142_p12 }
  0x1f   :  { %p145_p1 = pnand %p144_p0, %p138_p11 }
  0x21   :  { %148 = shalt.err (!%p145_p1)
}
  0x22   :  { %33 = dma.hbm_to_vmem [thread:$0]  %s234_s1, 256, %s28_s24, [#allocation6], %s178_s19, %s178_s19, %s179_s20  }
  0x23   :  { %171 = dma.done.wait [#allocation3], 256  }
  0x24   :  { %172 = vsyncadd [#allocation3], 4294967040 }
  0x25   :  { %173 = dma.done.wait [#allocation6], 256  }
  0x26   :  { %174 = vsyncadd [#allocation6], 4294967040  ;;  %v40_v0 = vld [vmem:[#allocation2] sm:$0xff]  ;;  %v41_v1 = vld [vmem:[#allocation2 + $0x8] sm:$0xff]  ;;  %s181_s1 = smov [#allocation7]  }
  0x27   :  { %v44_v2 = vmax.f32 %v40_v0, 1e-08  ;;  %v45_v3 = vmax.f32 %v41_v1, 1e-08  ;;  %v54_v4 = vsub.f32 1.0, %v40_v0  ;;  %v55_v5 = vsub.f32 1.0, %v41_v1 }
  0x28   :  { %v42_v8 = vld [vmem:[#allocation5] sm:$0xff]  ;;  %v43_v10 = vld [vmem:[#allocation5 + $0x8] sm:$0xff]  ;;  %s82_s6 = sshll.u32 %s181_s1, 4  ;;  %s83_s6 = int_to_ptr.vmem [resolvable:$true] %s82_s6 }
  0x29   :  { %97 = vlog2.f32 %v44_v2  ;;  %v56_v6 = vmax.f32 %v54_v4, 1e-08  ;;  %v57_v7 = vmax.f32 %v55_v5, 1e-08  ;;  %v52_v13 = vsub.f32 1.0, %v42_v8  ;;  %s149_s7 = scalar_lea.vmem %s83_s6, 16  ;;  %p154_p3 = scmp.lt.s32.totalorder %s83_s6, %s83_s6 }
  0x2a   :  { %99 = vlog2.f32 %v45_v3  ;;  %v53_v16 = vsub.f32 1.0, %v43_v10  ;;  %p150_p2 = scmp.ne.s32.totalorder %s83_s6, %s149_s7  ;;  %s153_s8 = scalar_lea.vmem %s83_s6, 32 }
  0x2b   :  { %101 = vlog2.f32 %v56_v6  ;;  %p155_p4 = scmp.lt.s32.totalorder %s153_s8, %s149_s7 }
  0x2c   :  { %103 = vlog2.f32 %v57_v7 }
  0x2d   :  { %p156_p5 = por %p155_p4, %p154_p3 }
  0x2f   :  { %p157_p6 = pnand %p156_p5, %p150_p2 }
  0x33   :  { %v98_v9 = vpop.eup %97 }
  0x34   :  { %v100_v11 = vpop.eup %99  ;;  %v47_v12 = vmul.f32 0.6931472, %v98_v9 }
  0x35   :  { %v102_v14 = vpop.eup %101  ;;  %v49_v15 = vmul.f32 0.6931472, %v100_v11 }
  0x36   :  { %v104_v17 = vpop.eup %103  ;;  %v59_v18 = vmul.f32 0.6931472, %v102_v14  ;;  %v50_v20 = vmul.f32 %v47_v12, %v42_v8 }
  0x37   :  { %v61_v19 = vmul.f32 0.6931472, %v104_v17  ;;  %v51_v22 = vmul.f32 %v49_v15, %v43_v10 }
  0x38   :  { %v62_v21 = vmul.f32 %v59_v18, %v52_v13 }
  0x39   :  { %v63_v23 = vmul.f32 %v61_v19, %v53_v16 }
  0x3a   :  { %v64_v24 = vmul.f32 %v62_v21, %v40_v0 }
  0x3b   :  { %v65_v25 = vmul.f32 %v63_v23, %v41_v1 }
  0x3c   :  { %v66_v26 = vadd.f32 %v64_v24, %v50_v20 }
  0x3d   :  { %v67_v27 = vadd.f32 %v65_v25, %v51_v22 }
  0x3f   :  { %v68_v28 = vadd.f32 %v67_v27, %v66_v26 }
  0x41   :  { %v69_v29 = vrot.slane %v68_v28, 4 }
  0x43   :  { %v70_v30 = vadd.f32 %v69_v29, %v68_v28 }
  0x45   :  { %v71_v31 = vrot.slane %v70_v30, 2 }
  0x47   :  { %v72_v32 = vadd.f32 %v71_v31, %v70_v30 }
  0x49   :  { %v73_v33 = vrot.slane %v72_v32, 1 }
  0x4b   :  { %v74_v34 = vadd.f32 %v73_v33, %v72_v32 }
  0x4d   :  { %75 = vst [vmem:[#allocation7] sm:$0x1] %v74_v34 }
  0x4e   :  { %160 = shalt.err (!%p157_p6)
}
  0x4f   :  { %s161_s11 = scalar_lea.hbm %s235_s2, 16 }
  0x50   :  { %p162_p7 = scmp.ne.s32.totalorder %s235_s2, %s161_s11  ;;  %p165_p8 = scmp.lt.u32.totalorder %s161_s11, %s235_s2 }
  0x52   :  { %p167_p9 = pnand %p165_p8, %p162_p7 }
  0x54   :  { %170 = shalt.err (!%p167_p9)
}
  0x55   :  { %85 = dma.vmem_to_hbm [thread:$0]  %s83_s6, 16, %s235_s2, [#allocation4]  }
  0x56   :  { %175 = dma.done.wait [#allocation4], 16  }
  0x57   :  { %176 = vsyncadd [#allocation4], 4294967280 }
  0x58   :  { %89 = vsyncpa [#allocation3], 1 }
  0x59   :  { %90 = vsyncpa [#allocation6], 1 }
  0x5a   :  { %91 = vsyncpa [#allocation4], 1 }

</bundles_post_ra>
